<compile_context>
chip_gen: v5e
topology: v5e:2x2
jax: 0.10.0
libtpu: 0.0.40
codegen_flags: <defaults>
</compile_context>

<pallas_src>
import functools

import jax
import jax.numpy as jnp
from jax.experimental import pallas as pl
from jax.experimental.pallas import tpu as pltpu


# ---------------------------------------------------------------------------
# Kernel: one grid step == Bt batch elements, everything fused in VMEM.
# ---------------------------------------------------------------------------
def _lff_kernel(
    x_ref,       # (Bt, Lp, Cin_p)
    w1_ref,      # (Cin_p, H_p)       expand 1x1 conv, BN1 scale folded in
    sew1_ref,    # (H_p, Hr_p)        SE fc1
    sew2_ref,    # (Hr_p, H_p)        SE fc2
    w2_ref,      # (H_p, Cout_p)      project 1x1 conv, BN3 scale folded in
    wd_ref,      # (Cin_p, Cout_p)    downsample 1x1 conv
    vecs_ref,    # (8, Wmax) f32: 0 bn1_b | 1 bn2_b | 2 se_b1 | 3 se_b2 | 4 bn3_b
                 #                5..7 depthwise taps (BN2 scale folded in)
    o_ref,       # (Bt, Lp, Cout_p)
    *,
    l_true,      # true (unpadded) sequence length
):
    Bt, Lp, Cin = x_ref.shape
    H = w1_ref.shape[1]
    Hr = sew1_ref.shape[1]
    Cout = o_ref.shape[-1]
    BtL = Bt * Lp
    wdt = w1_ref.dtype
    f32 = jnp.float32

    def h_swish(v):
        return v * (jnp.clip(v + 3.0, 0.0, 6.0) * (1.0 / 6.0))

    x2w = x_ref[...].reshape(BtL, Cin).astype(wdt)

    # ---- 1x1 expand conv (BN1 scale pre-folded) + bias + h_swish ----
    h = jnp.dot(x2w, w1_ref[...], preferred_element_type=f32)
    h = h_swish(h + vecs_ref[0:1, :H])

    pos = jax.lax.broadcasted_iota(jnp.int32, (BtL, 1), 0) % Lp
    if l_true != Lp:
        # Zero the L-padding rows so they contribute neither to the depthwise
        # taps of real rows nor to the SE pooling.
        valid = (pos < l_true).astype(f32)
        h = h * valid

    # ---- depthwise conv1d k=3, stride=1, zero-pad, strictly per batch ----
    # Sublane rolls (XLU) + (BtL,1) multiplicative boundary masks; accumulate
    # tap-by-tap to keep only one extra H_p-wide slab live at a time.
    mask_prev = (pos != 0).astype(f32)          # zero the wrap-around from roll
    mask_next = (pos != Lp - 1).astype(f32)
    d = h * vecs_ref[6:7, :H] + vecs_ref[1:2, :H]            # center tap + BN2 bias
    d = d + (pltpu.roll(h, shift=1, axis=0) * mask_prev) * vecs_ref[5:6, :H]
    d = d + (pltpu.roll(h, shift=BtL - 1, axis=0) * mask_next) * vecs_ref[7:8, :H]
    d = h_swish(d)

    # ---- SE: per-batch avg pool over true L -> FC -> ReLU -> FC -> h_sigmoid ----
    dm = d * valid if l_true != Lp else d
    y = jnp.sum(dm.reshape(Bt, Lp, H), axis=1) * (1.0 / l_true)       # (Bt, H)
    y = jnp.dot(y.astype(wdt), sew1_ref[...], preferred_element_type=f32)
    y = jnp.maximum(y + vecs_ref[2:3, :Hr], 0.0)                       # ReLU
    y = jnp.dot(y.astype(wdt), sew2_ref[...], preferred_element_type=f32)
    y = jnp.clip(y + vecs_ref[3:4, :H] + 3.0, 0.0, 6.0) * (1.0 / 6.0)  # h_sigmoid
    d = (d.reshape(Bt, Lp, H) * y[:, None, :]).reshape(BtL, H)

    # ---- 1x1 project (BN3 scale folded) + BN3 bias + downsample residual ----
    # Two accumulating dots (no lane-concat copy).
    out = (jnp.dot(d.astype(wdt), w2_ref[...], preferred_element_type=f32)
           + jnp.dot(x2w, wd_ref[...], preferred_element_type=f32)
           + vecs_ref[4:5, :Cout])

    o_ref[...] = out.reshape(Bt, Lp, Cout).astype(o_ref.dtype)


# ---------------------------------------------------------------------------
# Wrappers
# ---------------------------------------------------------------------------
def _round_up(n, m):
    return (n + m - 1) // m * m


def _vmem_limit_bytes():
    """Generation-aware VMEM limit: ~78% of physical per-core VMEM, capped."""
    phys = 64 * 1024 * 1024                       # conservative fallback (v7x TC)
    try:
        phys = int(pltpu.get_tpu_info().vmem_capacity_bytes)
    except Exception:
        pass
    return max(32 * 1024 * 1024, min(int(phys * 0.78), 100 * 1024 * 1024))


def locality_feed_forward(x, params, *, b_tile=None, weight_dtype=jnp.bfloat16):
    """x: (B, L, Cin) channels-last.  Returns (B, L, Cout)."""
    B, L, Cin = x.shape
    H = params["w1"].shape[1]
    Hr = params["se_w1"].shape[1]
    Cout = params["w2"].shape[1]

    # Lane-dense channel padding (multiples of 128); L padded to a multiple of 8
    # so the in-kernel (Bt, Lp, C) <-> (Bt*Lp, C) reshapes are layout no-ops.
    Cin_p, H_p = _round_up(Cin, 128), _round_up(H, 128)
    Hr_p, Cout_p = _round_up(Hr, 128), _round_up(Cout, 128)
    Wmax = max(H_p, Cout_p)
    Lp = _round_up(L, 8)

    wsize = jnp.dtype(weight_dtype).itemsize
    xsize = jnp.dtype(x.dtype).itemsize
    vmem_limit = _vmem_limit_bytes()

    # Live-bytes per batch element per grid step (pipeline + kernel temporaries).
    per_b = (2 * Lp * Cin_p * xsize          # double-buffered x block
             + 2 * Lp * Cout_p * xsize       # double-buffered output block
             + Lp * Cin_p * wsize            # x cast to matmul dtype
             + 4 * Lp * H_p * 4              # h, roll scratch, d, gated d (f32)
             + Lp * H_p * wsize              # d cast for the project matmul
             + Lp * Cout_p * 4)              # f32 accumulator before the store cast
    weight_bytes = 2 * ((Cin_p * H_p + H_p * Hr_p + Hr_p * H_p
                         + H_p * Cout_p + Cin_p * Cout_p) * wsize
                        + 8 * Wmax * 4)      # pipeline double-buffers constants too
    budget = vmem_limit - weight_bytes - (6 << 20)          # compiler headroom
    bt_cap = max(1, budget // per_b)

    # Target >=512 rows per step so the MXU M dimension (256-wide on v6e/v7x) is
    # well filled and the ~0.35us per-step overhead is amortized.
    bt_target = b_tile if b_tile is not None else max(1, -(-512 // Lp))
    Bt = int(max(1, min(B, bt_target, bt_cap)))
    Bp = _round_up(B, Bt)

    pads = ((0, Bp - B), (0, Lp - L), (0, Cin_p - Cin))
    xp = x if all(p == (0, 0) for p in pads) else jnp.pad(x, pads)

    # Fold eval-mode BN scales into the adjacent conv weights.
    w1 = params["w1"] * params["bn1_s"]          # (Cin, H)
    dw = params["dw"] * params["bn2_s"]          # (3, H)
    w2 = params["w2"] * params["bn3_s"]          # (H, Cout)

    def pad2(a, r, c):
        return jnp.pad(a, ((0, r - a.shape[0]), (0, c - a.shape[1])))

    w1p = pad2(w1, Cin_p, H_p).astype(weight_dtype)
    sew1p = pad2(params["se_w1"], H_p, Hr_p).astype(weight_dtype)
    sew2p = pad2(params["se_w2"], Hr_p, H_p).astype(weight_dtype)
    w2p = pad2(w2, H_p, Cout_p).astype(weight_dtype)
    wdp = pad2(params["wd"], Cin_p, Cout_p).astype(weight_dtype)

    # Pack all per-channel bias vectors + depthwise taps into one (8, Wmax) f32.
    f32 = jnp.float32
    vecs = jnp.zeros((8, Wmax), f32)
    vecs = vecs.at[0, :H].set(params["bn1_b"][0].astype(f32))
    vecs = vecs.at[1, :H].set(params["bn2_b"][0].astype(f32))
    vecs = vecs.at[2, :Hr].set(params["se_b1"][0].astype(f32))
    vecs = vecs.at[3, :H].set(params["se_b2"][0].astype(f32))
    vecs = vecs.at[4, :Cout].set(params["bn3_b"][0].astype(f32))
    vecs = vecs.at[5:8, :H].set(dw.astype(f32))

    def full(shape):
        return pl.BlockSpec(shape, lambda i: (0,) * len(shape))

    grid_spec = pltpu.PrefetchScalarGridSpec(
        num_scalar_prefetch=0,
        grid=(Bp // Bt,),
        in_specs=[
            pl.BlockSpec((Bt, Lp, Cin_p), lambda i: (i, 0, 0)),   # x block
            full((Cin_p, H_p)),                                   # w1 (BN1 folded)
            full((H_p, Hr_p)),                                    # SE fc1
            full((Hr_p, H_p)),                                    # SE fc2
            full((H_p, Cout_p)),                                  # w2 (BN3 folded)
            full((Cin_p, Cout_p)),                                # wd (downsample)
            full((8, Wmax)),                                      # packed biases/taps
        ],
        out_specs=pl.BlockSpec((Bt, Lp, Cout_p), lambda i: (i, 0, 0)),
    )

    out = pl.pallas_call(
        functools.partial(_lff_kernel, l_true=L),
        out_shape=jax.ShapeDtypeStruct((Bp, Lp, Cout_p), x.dtype),
        grid_spec=grid_spec,
        compiler_params=pltpu.CompilerParams(
            dimension_semantics=("parallel",),       # batch blocks are independent
            vmem_limit_bytes=vmem_limit,
        ),
    )(xp, w1p, sew1p, sew2p, w2p, wdp, vecs)

    if (Bp, Lp, Cout_p) != (B, L, Cout):
        out = out[:B, :L, :Cout]
    return out


def locality_feed_forward_ncl(x_ncl, params, **kw):
    """x_ncl: (B, Cin, L) — the PyTorch Conv1d layout.  Returns (B, Cout, L)."""
    y = locality_feed_forward(jnp.transpose(x_ncl, (0, 2, 1)), params, **kw)
    return jnp.transpose(y, (0, 2, 1))


# ---------------------------------------------------------------------------
# Plain-JAX reference (unfused math, channels-last) for self-check
# ---------------------------------------------------------------------------
def _reference(x, p):
    hsw = lambda v: v * (jnp.clip(v + 3.0, 0.0, 6.0) / 6.0)
    h = x @ p["w1"]
    h = hsw(h * p["bn1_s"] + p["bn1_b"])
    hp = jnp.pad(h, ((0, 0), (1, 1), (0, 0)))
    d = hp[:, :-2] * p["dw"][0] + hp[:, 1:-1] * p["dw"][1] + hp[:, 2:] * p["dw"][2]
    d = hsw(d * p["bn2_s"] + p["bn2_b"])
    y = d.mean(axis=1, keepdims=True)
    y = jnp.maximum(y @ p["se_w1"] + p["se_b1"], 0.0)
    y = y @ p["se_w2"] + p["se_b2"]
    y = jnp.clip(y + 3.0, 0.0, 6.0) / 6.0
    d = d * y
    out = (d @ p["w2"]) * p["bn3_s"] + p["bn3_b"]
    return out + x @ p["wd"]


# ---------------------------------------------------------------------------
# Deterministic parameter construction (BN running stats folded to scale/bias)
# ---------------------------------------------------------------------------
def make_params(key, in_c, out_c, expand_ratio=4, reduction=4, eps=1e-5):
    H = in_c * expand_ratio
    Hr = H // reduction
    ks = jax.random.split(key, 16)

    def bn(k, c):
        k1, k2, k3, k4 = jax.random.split(k, 4)
        gamma = 1.0 + 0.1 * jax.random.normal(k1, (1, c), jnp.float32)
        beta = 0.1 * jax.random.normal(k2, (1, c), jnp.float32)
        mean = 0.1 * jax.random.normal(k3, (1, c), jnp.float32)
        var = jnp.abs(1.0 + 0.1 * jax.random.normal(k4, (1, c), jnp.float32))
        scale = gamma / jnp.sqrt(var + eps)
        bias = beta - mean * scale
        return scale, bias

    bn1_s, bn1_b = bn(ks[1], H)
    bn2_s, bn2_b = bn(ks[3], H)
    bn3_s, bn3_b = bn(ks[5], out_c)

    return dict(
        w1=0.3 * jax.random.normal(ks[0], (in_c, H), jnp.float32),
        bn1_s=bn1_s, bn1_b=bn1_b,
        dw=0.3 * jax.random.normal(ks[2], (3, H), jnp.float32),
        bn2_s=bn2_s, bn2_b=bn2_b,
        se_w1=0.3 * jax.random.normal(ks[6], (H, Hr), jnp.float32),
        se_b1=0.1 * jax.random.normal(ks[7], (1, Hr), jnp.float32),
        se_w2=0.3 * jax.random.normal(ks[8], (Hr, H), jnp.float32),
        se_b2=0.1 * jax.random.normal(ks[9], (1, H), jnp.float32),
        w2=0.3 * jax.random.normal(ks[4], (H, out_c), jnp.float32),
        bn3_s=bn3_s, bn3_b=bn3_b,
        wd=0.3 * jax.random.normal(ks[10], (in_c, out_c), jnp.float32),
    )


if __name__ == "__main__":
    B, Cin, L = 2, 4, 16          # PyTorch x: (B, Cin, L)
    Cout = 4
    key = jax.random.PRNGKey(0)
    kx, kp, kx2, kx3 = jax.random.split(key, 4)

    params = make_params(kp, Cin, Cout)

    # --- check 1: PyTorch NCL layout entry point, f32 MXU operands, tight tol ---
    x_ncl = jax.random.normal(kx, (B, Cin, L), jnp.float32)
    out_ncl = locality_feed_forward_ncl(x_ncl, params, weight_dtype=jnp.float32)
    out_ncl = jax.block_until_ready(out_ncl)
    ref_ncl = jnp.transpose(
        _reference(jnp.transpose(x_ncl, (0, 2, 1)), params), (0, 2, 1))
    assert out_ncl.shape == (B, Cout, L)
    assert jnp.allclose(out_ncl, ref_ncl, atol=1e-3, rtol=1e-3), "NCL mismatch"

    # --- check 2: default bf16 MXU operands + non-divisible batch (padding,
    #     multi-step grid); looser tolerance for bf16 rounding ---
    x2 = jax.random.normal(kx2, (5, L, Cin), jnp.float32)       # channels-last
    out2 = jax.block_until_ready(locality_feed_forward(x2, params, b_tile=2))
    ref2 = _reference(x2, params)
    assert out2.shape == (5, L, Cout)
    assert jnp.allclose(out2, ref2, atol=5e-2, rtol=5e-2), "bf16 batched mismatch"

    # --- check 3: L not a multiple of 8 (exercises L padding + masked SE mean) ---
    x3 = jax.random.normal(kx3, (3, 13, Cin), jnp.float32)
    out3 = jax.block_until_ready(
        locality_feed_forward(x3, params, weight_dtype=jnp.float32))
    ref3 = _reference(x3, params)
    assert out3.shape == (3, 13, Cout)
    assert jnp.allclose(out3, ref3, atol=1e-3, rtol=1e-3), "ragged-L mismatch"

    print("KERNEL_OK")
</pallas_src>

<mosaic_0001>
module attributes {stable_mosaic.version = 11 : i64} {
  func.func @_lff_kernel(%arg0: i32, %arg1: memref<2x16x128xf32, #tpu.memory_space<vmem>>, %arg2: memref<128x128xf32, #tpu.memory_space<vmem>>, %arg3: memref<128x128xf32, #tpu.memory_space<vmem>>, %arg4: memref<128x128xf32, #tpu.memory_space<vmem>>, %arg5: memref<128x128xf32, #tpu.memory_space<vmem>>, %arg6: memref<128x128xf32, #tpu.memory_space<vmem>>, %arg7: memref<8x128xf32, #tpu.memory_space<vmem>>, %arg8: memref<2x16x128xf32, #tpu.memory_space<vmem>>) attributes {dimension_semantics = [#tpu.dimension_semantics<parallel>], iteration_bounds = array<i64: 1>, scalar_prefetch = 0 : i64, scratch_operands = 0 : i64, tpu.core_type = #tpu.core_type<tc>, window_params = [{transform_indices = @transform_0, window_bounds = array<i64: 2, 16, 128>}, {pipeline_mode = #tpu.pipeline_mode<synchronous>, transform_indices = @transform_1, window_bounds = array<i64: 128, 128>}, {pipeline_mode = #tpu.pipeline_mode<synchronous>, transform_indices = @transform_2, window_bounds = array<i64: 128, 128>}, {pipeline_mode = #tpu.pipeline_mode<synchronous>, transform_indices = @transform_3, window_bounds = array<i64: 128, 128>}, {pipeline_mode = #tpu.pipeline_mode<synchronous>, transform_indices = @transform_4, window_bounds = array<i64: 128, 128>}, {pipeline_mode = #tpu.pipeline_mode<synchronous>, transform_indices = @transform_5, window_bounds = array<i64: 128, 128>}, {pipeline_mode = #tpu.pipeline_mode<synchronous>, transform_indices = @transform_6, window_bounds = array<i64: 8, 128>}, {transform_indices = @transform_7, window_bounds = array<i64: 2, 16, 128>}]} {
    %c0 = arith.constant 0 : index
    %c0_0 = arith.constant 0 : index
    %c0_1 = arith.constant 0 : index
    %0 = vector.load %arg1[%c0, %c0_0, %c0_1] : memref<2x16x128xf32, #tpu.memory_space<vmem>>, vector<2x16x128xf32>
    %1 = vector.shape_cast %0 : vector<2x16x128xf32> to vector<32x128xf32>
    %c0_2 = arith.constant 0 : index
    %c0_3 = arith.constant 0 : index
    %2 = vector.load %arg2[%c0_2, %c0_3] : memref<128x128xf32, #tpu.memory_space<vmem>>, vector<128x128xf32>
    %cst = arith.constant dense<0.000000e+00> : vector<32x128xf32>
    %3 = tpu.matmul %1, %2, %cst {dimension_numbers = #tpu.dot_dimension_numbers<[1], [0], [0], [1], [0, 0, 1, 1], [], []>} : vector<32x128xf32>, vector<128x128xf32>, vector<32x128xf32> -> vector<32x128xf32>
    %c0_4 = arith.constant 0 : index
    %c0_5 = arith.constant 0 : index
    %4 = vector.load %arg7[%c0_4, %c0_5] : memref<8x128xf32, #tpu.memory_space<vmem>>, vector<1x128xf32>
    %5 = vector.broadcast %4 : vector<1x128xf32> to vector<32x128xf32>
    %6 = arith.addf %3, %5 : vector<32x128xf32>
    %cst_6 = arith.constant 3.000000e+00 : f32
    %7 = vector.broadcast %cst_6 : f32 to vector<32x128xf32>
    %8 = arith.addf %6, %7 : vector<32x128xf32>
    %cst_7 = arith.constant 0.000000e+00 : f32
    %cst_8 = arith.constant 6.000000e+00 : f32
    %9 = vector.broadcast %cst_7 : f32 to vector<32x128xf32>
    %10 = arith.maximumf %9, %8 : vector<32x128xf32>
    %11 = vector.broadcast %cst_8 : f32 to vector<32x128xf32>
    %12 = arith.minimumf %11, %10 : vector<32x128xf32>
    %cst_9 = arith.constant 0.166666672 : f32
    %13 = vector.broadcast %cst_9 : f32 to vector<32x128xf32>
    %14 = arith.mulf %12, %13 : vector<32x128xf32>
    %15 = arith.mulf %6, %14 : vector<32x128xf32>
    %16 = tpu.iota {dimensions = array<i32: 0>} : vector<32x1xi32>
    %c16_i32 = arith.constant 16 : i32
    %c0_i32 = arith.constant 0 : i32
    %17 = arith.cmpi eq, %c16_i32, %c0_i32 : i32
    %c1_i32 = arith.constant 1 : i32
    %18 = arith.select %17, %c1_i32, %c16_i32 : i32
    %19 = vector.broadcast %18 : i32 to vector<32x1xi32>
    %20 = arith.remsi %16, %19 : vector<32x1xi32>
    %c0_i32_10 = arith.constant 0 : i32
    %21 = vector.broadcast %c0_i32_10 : i32 to vector<32x1xi32>
    %22 = arith.cmpi ne, %20, %21 : vector<32x1xi32>
    %c0_i32_11 = arith.constant 0 : i32
    %23 = vector.broadcast %c0_i32_11 : i32 to vector<32x1xi32>
    %24 = arith.cmpi slt, %20, %23 : vector<32x1xi32>
    %c0_i32_12 = arith.constant 0 : i32
    %25 = arith.cmpi slt, %18, %c0_i32_12 : i32
    %26 = vector.broadcast %25 : i1 to vector<32x1xi1>
    %27 = vector.broadcast %26 : vector<32x1xi1> to vector<32x1xi1>
    %28 = arith.xori %24, %27 : vector<32x1xi1>
    %29 = arith.andi %28, %22 : vector<32x1xi1>
    %30 = vector.broadcast %18 : i32 to vector<32x1xi32>
    %31 = arith.addi %20, %30 : vector<32x1xi32>
    %32 = arith.select %29, %31, %20 : vector<32x1xi1>, vector<32x1xi32>
    %c0_i32_13 = arith.constant 0 : i32
    %33 = vector.broadcast %c0_i32_13 : i32 to vector<32x1xi32>
    %34 = arith.cmpi ne, %32, %33 : vector<32x1xi32>
    %35 = arith.extui %34 : vector<32x1xi1> to vector<32x1xi32>
    %36 = arith.sitofp %35 : vector<32x1xi32> to vector<32x1xf32>
    %c15_i32 = arith.constant 15 : i32
    %37 = vector.broadcast %c15_i32 : i32 to vector<32x1xi32>
    %38 = arith.cmpi ne, %32, %37 : vector<32x1xi32>
    %39 = arith.extui %38 : vector<32x1xi1> to vector<32x1xi32>
    %40 = arith.sitofp %39 : vector<32x1xi32> to vector<32x1xf32>
    %c6 = arith.constant 6 : index
    %c0_14 = arith.constant 0 : index
    %41 = vector.load %arg7[%c6, %c0_14] : memref<8x128xf32, #tpu.memory_space<vmem>>, vector<1x128xf32>
    %42 = vector.broadcast %41 : vector<1x128xf32> to vector<32x128xf32>
    %43 = arith.mulf %15, %42 : vector<32x128xf32>
    %c1 = arith.constant 1 : index
    %c0_15 = arith.constant 0 : index
    %44 = vector.load %arg7[%c1, %c0_15] : memref<8x128xf32, #tpu.memory_space<vmem>>, vector<1x128xf32>
    %45 = vector.broadcast %44 : vector<1x128xf32> to vector<32x128xf32>
    %46 = arith.addf %43, %45 : vector<32x128xf32>
    %c1_i32_16 = arith.constant 1 : i32
    %47 = tpu.dynamic_rotate %15 by %c1_i32_16 dim 0 : vector<32x128xf32>, i32 -> vector<32x128xf32>
    %48 = vector.broadcast %36 : vector<32x1xf32> to vector<32x128xf32>
    %49 = arith.mulf %47, %48 : vector<32x128xf32>
    %c5 = arith.constant 5 : index
    %c0_17 = arith.constant 0 : index
    %50 = vector.load %arg7[%c5, %c0_17] : memref<8x128xf32, #tpu.memory_space<vmem>>, vector<1x128xf32>
    %51 = vector.broadcast %50 : vector<1x128xf32> to vector<32x128xf32>
    %52 = arith.mulf %49, %51 : vector<32x128xf32>
    %53 = arith.addf %46, %52 : vector<32x128xf32>
    %c31_i32 = arith.constant 31 : i32
    %54 = tpu.dynamic_rotate %15 by %c31_i32 dim 0 : vector<32x128xf32>, i32 -> vector<32x128xf32>
    %55 = vector.broadcast %40 : vector<32x1xf32> to vector<32x128xf32>
    %56 = arith.mulf %54, %55 : vector<32x128xf32>
    %c7 = arith.constant 7 : index
    %c0_18 = arith.constant 0 : index
    %57 = vector.load %arg7[%c7, %c0_18] : memref<8x128xf32, #tpu.memory_space<vmem>>, vector<1x128xf32>
    %58 = vector.broadcast %57 : vector<1x128xf32> to vector<32x128xf32>
    %59 = arith.mulf %56, %58 : vector<32x128xf32>
    %60 = arith.addf %53, %59 : vector<32x128xf32>
    %cst_19 = arith.constant 3.000000e+00 : f32
    %61 = vector.broadcast %cst_19 : f32 to vector<32x128xf32>
    %62 = arith.addf %60, %61 : vector<32x128xf32>
    %cst_20 = arith.constant 0.000000e+00 : f32
    %cst_21 = arith.constant 6.000000e+00 : f32
    %63 = vector.broadcast %cst_20 : f32 to vector<32x128xf32>
    %64 = arith.maximumf %63, %62 : vector<32x128xf32>
    %65 = vector.broadcast %cst_21 : f32 to vector<32x128xf32>
    %66 = arith.minimumf %65, %64 : vector<32x128xf32>
    %cst_22 = arith.constant 0.166666672 : f32
    %67 = vector.broadcast %cst_22 : f32 to vector<32x128xf32>
    %68 = arith.mulf %66, %67 : vector<32x128xf32>
    %69 = arith.mulf %60, %68 : vector<32x128xf32>
    %70 = vector.shape_cast %69 : vector<32x128xf32> to vector<2x16x128xf32>
    %cst_23 = arith.constant dense<0.000000e+00> : vector<2x128xf32>
    %71 = vector.multi_reduction <add>, %70, %cst_23 [1] : vector<2x16x128xf32> to vector<2x128xf32>
    %cst_24 = arith.constant 6.250000e-02 : f32
    %72 = vector.broadcast %cst_24 : f32 to vector<2x128xf32>
    %73 = arith.mulf %71, %72 : vector<2x128xf32>
    %c0_25 = arith.constant 0 : index
    %c0_26 = arith.constant 0 : index
    %74 = vector.load %arg3[%c0_25, %c0_26] : memref<128x128xf32, #tpu.memory_space<vmem>>, vector<128x128xf32>
    %cst_27 = arith.constant dense<0.000000e+00> : vector<2x128xf32>
    %75 = tpu.matmul %73, %74, %cst_27 {dimension_numbers = #tpu.dot_dimension_numbers<[1], [0], [0], [1], [0, 0, 1, 1], [], []>} : vector<2x128xf32>, vector<128x128xf32>, vector<2x128xf32> -> vector<2x128xf32>
    %c2 = arith.constant 2 : index
    %c0_28 = arith.constant 0 : index
    %76 = vector.load %arg7[%c2, %c0_28] : memref<8x128xf32, #tpu.memory_space<vmem>>, vector<1x128xf32>
    %77 = vector.broadcast %76 : vector<1x128xf32> to vector<2x128xf32>
    %78 = arith.addf %75, %77 : vector<2x128xf32>
    %cst_29 = arith.constant 0.000000e+00 : f32
    %79 = vector.broadcast %cst_29 : f32 to vector<2x128xf32>
    %80 = arith.maximumf %78, %79 : vector<2x128xf32>
    %c0_30 = arith.constant 0 : index
    %c0_31 = arith.constant 0 : index
    %81 = vector.load %arg4[%c0_30, %c0_31] : memref<128x128xf32, #tpu.memory_space<vmem>>, vector<128x128xf32>
    %cst_32 = arith.constant dense<0.000000e+00> : vector<2x128xf32>
    %82 = tpu.matmul %80, %81, %cst_32 {dimension_numbers = #tpu.dot_dimension_numbers<[1], [0], [0], [1], [0, 0, 1, 1], [], []>} : vector<2x128xf32>, vector<128x128xf32>, vector<2x128xf32> -> vector<2x128xf32>
    %c3 = arith.constant 3 : index
    %c0_33 = arith.constant 0 : index
    %83 = vector.load %arg7[%c3, %c0_33] : memref<8x128xf32, #tpu.memory_space<vmem>>, vector<1x128xf32>
    %84 = vector.broadcast %83 : vector<1x128xf32> to vector<2x128xf32>
    %85 = arith.addf %82, %84 : vector<2x128xf32>
    %cst_34 = arith.constant 3.000000e+00 : f32
    %86 = vector.broadcast %cst_34 : f32 to vector<2x128xf32>
    %87 = arith.addf %85, %86 : vector<2x128xf32>
    %cst_35 = arith.constant 0.000000e+00 : f32
    %cst_36 = arith.constant 6.000000e+00 : f32
    %88 = vector.broadcast %cst_35 : f32 to vector<2x128xf32>
    %89 = arith.maximumf %88, %87 : vector<2x128xf32>
    %90 = vector.broadcast %cst_36 : f32 to vector<2x128xf32>
    %91 = arith.minimumf %90, %89 : vector<2x128xf32>
    %cst_37 = arith.constant 0.166666672 : f32
    %92 = vector.broadcast %cst_37 : f32 to vector<2x128xf32>
    %93 = arith.mulf %91, %92 : vector<2x128xf32>
    %94 = vector.shape_cast %69 : vector<32x128xf32> to vector<2x16x128xf32>
    %95 = vector.shape_cast %93 : vector<2x128xf32> to vector<2x1x128xf32>
    %96 = vector.broadcast %95 : vector<2x1x128xf32> to vector<2x16x128xf32>
    %97 = arith.mulf %94, %96 : vector<2x16x128xf32>
    %98 = vector.shape_cast %97 : vector<2x16x128xf32> to vector<32x128xf32>
    %c0_38 = arith.constant 0 : index
    %c0_39 = arith.constant 0 : index
    %99 = vector.load %arg5[%c0_38, %c0_39] : memref<128x128xf32, #tpu.memory_space<vmem>>, vector<128x128xf32>
    %cst_40 = arith.constant dense<0.000000e+00> : vector<32x128xf32>
    %100 = tpu.matmul %98, %99, %cst_40 {dimension_numbers = #tpu.dot_dimension_numbers<[1], [0], [0], [1], [0, 0, 1, 1], [], []>} : vector<32x128xf32>, vector<128x128xf32>, vector<32x128xf32> -> vector<32x128xf32>
    %c0_41 = arith.constant 0 : index
    %c0_42 = arith.constant 0 : index
    %101 = vector.load %arg6[%c0_41, %c0_42] : memref<128x128xf32, #tpu.memory_space<vmem>>, vector<128x128xf32>
    %cst_43 = arith.constant dense<0.000000e+00> : vector<32x128xf32>
    %102 = tpu.matmul %1, %101, %cst_43 {dimension_numbers = #tpu.dot_dimension_numbers<[1], [0], [0], [1], [0, 0, 1, 1], [], []>} : vector<32x128xf32>, vector<128x128xf32>, vector<32x128xf32> -> vector<32x128xf32>
    %103 = arith.addf %100, %102 : vector<32x128xf32>
    %c4 = arith.constant 4 : index
    %c0_44 = arith.constant 0 : index
    %104 = vector.load %arg7[%c4, %c0_44] : memref<8x128xf32, #tpu.memory_space<vmem>>, vector<1x128xf32>
    %105 = vector.broadcast %104 : vector<1x128xf32> to vector<32x128xf32>
    %106 = arith.addf %103, %105 : vector<32x128xf32>
    %107 = vector.shape_cast %106 : vector<32x128xf32> to vector<2x16x128xf32>
    %c0_45 = arith.constant 0 : index
    %c0_46 = arith.constant 0 : index
    %c0_47 = arith.constant 0 : index
    %108 = vector.load %arg8[%c0_45, %c0_46, %c0_47] : memref<2x16x128xf32, #tpu.memory_space<vmem>>, vector<2x16x128xf32>
    tpu.vector_store %arg8[%c0_45, %c0_46, %c0_47], %107 {strides = array<i32>} : memref<2x16x128xf32, #tpu.memory_space<vmem>>, vector<2x16x128xf32>,
    return
  }
  func.func @transform_0(%arg0: i32) -> (i32, i32, i32) {
    %c0_i32 = arith.constant 0 : i32
    %c0_i32_0 = arith.constant 0 : i32
    %c0_i32_1 = arith.constant 0 : i32
    return %arg0, %c0_i32, %c0_i32_0 : i32, i32, i32
  }
  func.func @transform_1(%arg0: i32) -> (i32, i32) {
    %c0_i32 = arith.constant 0 : i32
    %c0_i32_0 = arith.constant 0 : i32
    %c0_i32_1 = arith.constant 0 : i32
    return %c0_i32, %c0_i32_0 : i32, i32
  }
  func.func @transform_2(%arg0: i32) -> (i32, i32) {
    %c0_i32 = arith.constant 0 : i32
    %c0_i32_0 = arith.constant 0 : i32
    %c0_i32_1 = arith.constant 0 : i32
    return %c0_i32, %c0_i32_0 : i32, i32
  }
  func.func @transform_3(%arg0: i32) -> (i32, i32) {
    %c0_i32 = arith.constant 0 : i32
    %c0_i32_0 = arith.constant 0 : i32
    %c0_i32_1 = arith.constant 0 : i32
    return %c0_i32, %c0_i32_0 : i32, i32
  }
  func.func @transform_4(%arg0: i32) -> (i32, i32) {
    %c0_i32 = arith.constant 0 : i32
    %c0_i32_0 = arith.constant 0 : i32
    %c0_i32_1 = arith.constant 0 : i32
    return %c0_i32, %c0_i32_0 : i32, i32
  }
  func.func @transform_5(%arg0: i32) -> (i32, i32) {
    %c0_i32 = arith.constant 0 : i32
    %c0_i32_0 = arith.constant 0 : i32
    %c0_i32_1 = arith.constant 0 : i32
    return %c0_i32, %c0_i32_0 : i32, i32
  }
  func.func @transform_6(%arg0: i32) -> (i32, i32) {
    %c0_i32 = arith.constant 0 : i32
    %c0_i32_0 = arith.constant 0 : i32
    %c0_i32_1 = arith.constant 0 : i32
    return %c0_i32, %c0_i32_0 : i32, i32
  }
  func.func @transform_7(%arg0: i32) -> (i32, i32, i32) {
    %c0_i32 = arith.constant 0 : i32
    %c0_i32_0 = arith.constant 0 : i32
    %c0_i32_1 = arith.constant 0 : i32
    return %arg0, %c0_i32, %c0_i32_0 : i32, i32, i32
  }
}

</mosaic_0001>

<bundles_post_ra>
// kernel: tpu_custom_call.1
= control target key start
LH: loop header
LB: loop body
LE: loop exit
PB: predicated region body
PF: predicated region fallthrough
CT: control target
= control target key end

     0   :  { %12 = vsyncpa [#allocation3], 0  ;;  %s1001_s0 = inlined_call_operand.hbm [shape: f32[2,16,128], index: 0, kind: input, shape index: {}]   ;;  %s1002_s1 = inlined_call_operand.hbm [shape: f32[128,128], index: 1, kind: input, shape index: {}]   ;;  %s1003_s2 = inlined_call_operand.hbm [shape: f32[128,128], index: 2, kind: input, shape index: {}]   ;;  %s1004_s3 = inlined_call_operand.hbm [shape: f32[128,128], index: 3, kind: input, shape index: {}]   ;;  %s1005_s4 = inlined_call_operand.hbm [shape: f32[128,128], index: 4, kind: input, shape index: {}]   ;;  %s1006_s5 = inlined_call_operand.hbm [shape: f32[128,128], index: 5, kind: input, shape index: {}]   ;;  %s1007_s6 = inlined_call_operand.hbm [shape: f32[8,128], index: 6, kind: input, shape index: {}]   ;;  %s1008_s7 = inlined_call_operand.hbm [shape: f32[2,16,128], index: 7, kind: output, shape index: {}]  }
   0x1   :  { %13 = vsyncpa [#allocation6], 0 }
   0x2   :  { %14 = vsyncpa [#allocation9], 0 }
   0x3   :  { %15 = vsyncpa [#allocation12], 0 }
   0x4   :  { %16 = vsyncpa [#allocation4], 0  ;;  %s34_s26 = sshll.u32 %s1002_s1, 4  ;;  %s819_s27 = smov [#allocation5]   ;;  %s35_s26 = int_to_ptr.hbm [resolvable:$true] %s34_s26 }
   0x5   :  { %s36_s28 = sshll.u32 %s819_s27, 4  ;;  %s60_s8 = sshll.u32 %s1004_s3, 4  ;;  %s37_s28 = int_to_ptr.vmem [resolvable:$true] %s36_s28  ;;  %s61_s8 = int_to_ptr.hbm [resolvable:$true] %s60_s8 }
   0x6   :  { %s820_s9 = smov 128   ;;  %s821_s10 = smov 8  }
   0x7   :  { %42 = dma.hbm_to_vmem [thread:$0]  %s35_s26, 2048, %s37_s28, [#allocation6], %s820_s9, %s820_s9, %s821_s10  }
   0x8   :  { %s822_s11 = smov [#allocation8]   ;;  %s86_s1 = sshll.u32 %s1006_s5, 4  ;;  %s87_s1 = int_to_ptr.hbm [resolvable:$true] %s86_s1 }
   0x9   :  { %s62_s12 = sshll.u32 %s822_s11, 4  ;;  %s21_s16 = sshll.u32 %s1001_s0, 4  ;;  %s63_s12 = int_to_ptr.vmem [resolvable:$true] %s62_s12  ;;  %s22_s16 = int_to_ptr.hbm [resolvable:$true] %s21_s16 }
   0xa   :  { %68 = dma.hbm_to_vmem [thread:$0]  %s61_s8, 2048, %s63_s12, [#allocation9], %s820_s9, %s820_s9, %s821_s10  }
   0xb   :  { %s823_s17 = smov [#allocation11]   ;;  %s824_s19 = smov [#allocation2]  }
   0xc   :  { %s88_s18 = sshll.u32 %s823_s17, 4  ;;  %s23_s5 = sshll.u32 %s824_s19, 4  ;;  %s89_s18 = int_to_ptr.vmem [resolvable:$true] %s88_s18  ;;  %s24_s5 = int_to_ptr.vmem [resolvable:$true] %s23_s5 }
   0xd   :  { %94 = dma.hbm_to_vmem [thread:$0]  %s87_s1, 2048, %s89_s18, [#allocation12], %s820_s9, %s820_s9, %s821_s10  }
   0xe   :  { %s47_s22 = sshll.u32 %s1003_s2, 4  ;;  %s73_s24 = sshll.u32 %s1005_s4, 4  ;;  %s48_s22 = int_to_ptr.hbm [resolvable:$true] %s47_s22  ;;  %s74_s24 = int_to_ptr.hbm [resolvable:$true] %s73_s24 }
   0xf   :  { %29 = dma.hbm_to_vmem [thread:$0]  %s22_s16, 512, %s24_s5, [#allocation3], %s820_s9, %s820_s9, %s821_s10  }
  0x10   :  { %s825_s25 = smov [#allocation7]   ;;  %s826_s27 = smov [#allocation10]  }
  0x11   :  { %s49_s26 = sshll.u32 %s825_s25, 4  ;;  %s75_s2 = sshll.u32 %s826_s27, 4  ;;  %s50_s26 = int_to_ptr.vmem [resolvable:$true] %s49_s26  ;;  %s76_s2 = int_to_ptr.vmem [resolvable:$true] %s75_s2 }
  0x12   :  { %55 = dma.hbm_to_vmem [thread:$0]  %s48_s22, 2048, %s50_s26, [#allocation6], %s820_s9, %s820_s9, %s821_s10  }
  0x13   :  { %s100_s30 = sshll.u32 %s1007_s6, 4  ;;  %s827_s4 = smov [#allocation13]   ;;  %s101_s30 = int_to_ptr.hbm [resolvable:$true] %s100_s30 }
  0x14   :  { %81 = dma.hbm_to_vmem [thread:$0]  %s74_s24, 2048, %s76_s2, [#allocation9], %s820_s9, %s820_s9, %s821_s10  }
  0x15   :  { %s102_s8 = sshll.u32 %s827_s4, 4  ;;  %s103_s8 = int_to_ptr.vmem [resolvable:$true] %s102_s8 }
  0x16   :  { %105 = dma.hbm_to_vmem [thread:$0]  %s101_s30, 128, %s103_s8, [#allocation12]  }
  0x17   :  { %809 = dma.done.wait [#allocation3], 512  }
  0x18   :  { %810 = vsyncadd [#allocation3], 4294966784 }
  0x19   :  { %811 = dma.done.wait [#allocation6], 4096  }
  0x1a   :  { %812 = vsyncadd [#allocation6], 4294963200 }
  0x1b   :  { %813 = dma.done.wait [#allocation9], 4096  }
  0x1c   :  { %814 = vsyncadd [#allocation9], 4294963200 }
  0x1d   :  { %815 = dma.done.wait [#allocation12], 2176  }
  0x1e   :  { %816 = vsyncadd [#allocation12], 4294965120  ;;  %v153_v0 = vld [vmem:[#allocation5 + $0x78] sm:$0xff]  ;;  %v152_v1 = vld [vmem:[#allocation5 + $0x70] sm:$0xff]  ;;  %v205_v27 = vlaneseq  ;;  %vm396_vm6 = vcmask 1041409   ;;  %s829_s6 = smov [#allocation14]  }
  0x1f   :  { %156 = vmatpush.msra.mxu1 %v153_v0  ;;  %v151_v2 = vld [vmem:[#allocation5 + $0x68] sm:$0xff]  ;;  %v150_v3 = vld [vmem:[#allocation5 + $0x60] sm:$0xff]  ;;  %v149_v4 = vld [vmem:[#allocation5 + $0x58] sm:$0xff]  ;;  %s576_s11 = sshll.u32 %s829_s6, 4  ;;  %s578_s14 = sshll.u32 %s1008_s7, 4  ;;  %s577_s11 = int_to_ptr.vmem [resolvable:$true] %s576_s11  ;;  %s579_s14 = int_to_ptr.hbm [resolvable:$true] %s578_s14 }
  0x20   :  { %v148_v5 = vld [vmem:[#allocation5 + $0x50] sm:$0xff]  ;;  %v147_v6 = vld [vmem:[#allocation5 + $0x48] sm:$0xff]  ;;  %v146_v7 = vld [vmem:[#allocation5 + $0x40] sm:$0xff]  ;;  %v921_v32 = vshrl.u32 %v205_v27, 7 }
  0x21   :  { %157 = vmatpush.msra.mxu1 %v152_v1  ;;  %v145_v8 = vld [vmem:[#allocation5 + $0x38] sm:$0xff]  ;;  %v144_v9 = vld [vmem:[#allocation5 + $0x30] sm:$0xff]  ;;  %v143_v10 = vld [vmem:[#allocation5 + $0x28] sm:$0xff] }
  0x22   :  { %v142_v11 = vld [vmem:[#allocation5 + $0x20] sm:$0xff]  ;;  %v141_v12 = vld [vmem:[#allocation5 + $0x18] sm:$0xff]  ;;  %v140_v13 = vld [vmem:[#allocation5 + $0x10] sm:$0xff]  ;;  %v208_v36 = vadd.s32 16, %v921_v32  ;;  %v207_v41 = vadd.s32 8, %v921_v32  ;;  %vm298_vm0 = vcmp.lt.s32.totalorder %v921_v32, 1 }
  0x23   :  { %158 = vmatpush.msra.mxu1 %v151_v2  ;;  %v139_v14 = vld [vmem:[#allocation5 + $0x8] sm:$0xff]  ;;  %v138_v15 = vld [vmem:[#allocation5] sm:$0xff]  ;;  %v915_v18 = vld [vmem:[#allocation2 + $0x10] sm:$0xff]  ;;  %v209_v63 = vadd.s32 24, %v921_v32  ;;  %vm321_vm3 = vcmp.lt.s32.totalorder %v921_v32, 7 }
  0x24   :  { %v909_v16 = vld [vmem:[#allocation2] sm:$0xff]  ;;  %v912_v17 = vld [vmem:[#allocation2 + $0x8] sm:$0xff]  ;;  %v918_v19 = vld [vmem:[#allocation2 + $0x18] sm:$0xff]  ;;  %v228_v45 = vand.u32 15, %v208_v36  ;;  %v221_v49 = vand.u32 15, %v207_v41 }
  0x25   :  { %159 = vmatpush.msra.mxu1 %v150_v3  ;;  %v609_v20 = vld [vmem:[#allocation13] ss:$0 sm:$0xff]  ;;  %v391_v29 = vld [vmem:[#allocation7 + $0x78] sm:$0xff]  ;;  %v390_v33 = vld [vmem:[#allocation7 + $0x70] sm:$0xff] }
  0x26   :  { %v389_v37 = vld [vmem:[#allocation7 + $0x68] sm:$0xff]  ;;  %v388_v42 = vld [vmem:[#allocation7 + $0x60] sm:$0xff]  ;;  %v387_v46 = vld [vmem:[#allocation7 + $0x58] sm:$0xff]  ;;  %vm931_vm1 = vcmp.ne.s32.totalorder %v228_v45, 0  ;;  %vm271_vm2 = vcmp.ne.s32.totalorder %v221_v49, 15 }
  0x27   :  { %160 = vmatpush.msra.mxu1 %v149_v4  ;;  %v386_v50 = vld [vmem:[#allocation7 + $0x50] sm:$0xff]  ;;  %v385_v51 = vld [vmem:[#allocation7 + $0x48] sm:$0xff]  ;;  %v610_v54 = vld [vmem:[#allocation13 + $0x6] ss:$0 sm:$0xff] }
  0x28   :  { %v384_v57 = vld [vmem:[#allocation7 + $0x40] sm:$0xff]  ;;  %v383_v0 = vld [vmem:[#allocation7 + $0x38] sm:$0xff]  ;;  %v377_v49 = vld [vmem:[#allocation7 + $0x8] sm:$0xff] }
  0x29   :  { %161 = vmatpush.msra.mxu1 %v148_v5  ;;  %v937_v62 = vld [vmem:[#allocation13 + $0x5] ss:$0 sm:$0xff]  ;;  %v611_v4 = vld [vmem:[#allocation13 + $0x1] ss:$0 sm:$0xff]  ;;  %v828_v5 = vmov 0.0  }
  0x2b   :  { %162 = vmatpush.msra.mxu1 %v147_v6  ;;  %v595_v6 = vsel %vm931_vm1, 1.0, %v828_v5 }
  0x2d   :  { %163 = vmatpush.msra.mxu1 %v146_v7  ;;  %v596_v7 = vsel %vm271_vm2, 1.0, %v828_v5 }
  0x2f   :  { %164 = vmatpush.msra.mxu1 %v145_v8  ;;  %v214_v8 = vand.u32 15, %v921_v32 }
  0x31   :  { %165 = vmatpush.msra.mxu1 %v144_v9  ;;  %v382_v9 = vld [vmem:[#allocation7 + $0x30] sm:$0xff]  ;;  %vm258_vm4 = vcmp.ne.s32.totalorder %v214_v8, 0 }
  0x33   :  { %166 = vmatpush.msra.mxu1 %v143_v10 }
  0x35   :  { %167 = vmatpush.msra.mxu1 %v142_v11 }
  0x37   :  { %168 = vmatpush.msra.mxu1 %v141_v12 }
  0x39   :  { %169 = vmatpush.msra.mxu1 %v140_v13 }
  0x3b   :  { %170 = vmatpush.msra.mxu1 %v139_v14 }
  0x3d   :  { %171 = vmatpush.msra.mxu1 %v138_v15 }
  0x3e   :  { %172 = vmatmul.f32.vlgmr.msra.gmra.mxu1 %v909_v16 }
  0x3f   :  { %399 = vmatpush.msrb.mxu1 %v391_v29  ;;  %v380_v29 = vld [vmem:[#allocation7 + $0x20] sm:$0xff] }
  0x41   :  { %400 = vmatpush.msrb.mxu1 %v390_v33 }
  0x43   :  { %401 = vmatpush.msrb.mxu1 %v389_v37 }
  0x45   :  { %402 = vmatpush.msrb.mxu1 %v388_v42 }
  0x46   :  { %175 = vmatmul.f32.gmra.mxu1 %v912_v17 }
  0x47   :  { %403 = vmatpush.msrb.mxu1 %v387_v46 }
  0x49   :  { %404 = vmatpush.msrb.mxu1 %v386_v50 }
  0x4b   :  { %405 = vmatpush.msrb.mxu1 %v385_v51 }
  0x4d   :  { %406 = vmatpush.msrb.mxu1 %v384_v57 }
  0x4e   :  { %178 = vmatmul.f32.gmra.mxu1 %v915_v18 }
  0x4f   :  { %407 = vmatpush.msrb.mxu1 %v383_v0 }
  0x51   :  { %408 = vmatpush.msrb.mxu1 %v382_v9 }
  0x56   :  { %181 = vmatmul.f32.gmra.mxu1 %v918_v19 }
  0xbb   :  { %v173_v21 = vpop.f32.mrf.mxu1 }
  0xbc   :  { %v174_v22 = vadd.f32 %v609_v20, %v173_v21  ;;  %v381_v21 = vld [vmem:[#allocation7 + $0x28] sm:$0xff] }
  0xbd   :  { %409 = vmatpush.msrb.mxu1 %v381_v21  ;;  %v431_v21 = vld [vmem:[#allocation8 + $0x58] sm:$0xff] }
  0xbe   :  { %v185_v23 = vadd.f32 3.0, %v174_v22 }
  0xbf   :  { %410 = vmatpush.msrb.mxu1 %v380_v29  ;;  %v429_v29 = vld [vmem:[#allocation8 + $0x48] sm:$0xff] }
  0xc0   :  { %v189_v25 = vmax.f32 %v185_v23, 0.0 }
  0xc2   :  { %v193_v30 = vmin.f32 %v189_v25, 6.0  ;;  %v613_v25 = vld [vmem:[#allocation13 + $0x7] ss:$0 sm:$0xff] }
  0xc3   :  { %v176_v24 = vpop.f32.mrf.mxu1 }
  0xc4   :  { %v177_v26 = vadd.f32 %v609_v20, %v176_v24  ;;  %v197_v38 = vmul.f32 0.16666667, %v193_v30 }
  0xc6   :  { %v186_v28 = vadd.f32 3.0, %v177_v26  ;;  %v927_v47 = vmul.f32 %v197_v38, %v174_v22 }
  0xc8   :  { %v190_v31 = vmax.f32 %v186_v28, 0.0  ;;  %v294_v58 = vrot.slane %v927_v47, 7  ;;  %v284_v45 = vmul.f32 %v610_v54, %v927_v47  ;;  %v317_v46 = vrot.slane %v927_v47, 1 }
  0xca   :  { %v194_v34 = vmin.f32 %v190_v31, 6.0  ;;  %v290_v47 = vadd.f32 %v611_v4, %v284_v45  ;;  %v425_v45 = vld [vmem:[#allocation8 + $0x28] sm:$0xff] }
  0xcb   :  { %v179_v35 = vpop.f32.mrf.mxu1 }
  0xcc   :  { %v198_v39 = vmul.f32 0.16666667, %v194_v34  ;;  %v180_v40 = vadd.f32 %v609_v20, %v179_v35  ;;  %v379_v35 = vld [vmem:[#allocation7 + $0x18] sm:$0xff] }
  0xcd   :  { %411 = vmatpush.msrb.mxu1 %v379_v35 }
  0xce   :  { %v925_v43 = vmul.f32 %v198_v39, %v177_v26  ;;  %v187_v44 = vadd.f32 3.0, %v180_v40  ;;  %v594_v39 = vsel %vm258_vm4, 1.0, %v828_v5 }
  0xd0   :  { %v191_v48 = vmax.f32 %v187_v44, 0.0  ;;  %v295_v52 = vrot.slane %v925_v43, 7  ;;  %v285_v61 = vmul.f32 %v610_v54, %v925_v43  ;;  %v318_v10 = vrot.slane %v925_v43, 1 }
  0xd2   :  { %v195_v53 = vmin.f32 %v191_v48, 6.0  ;;  %v301_v1 = vsel %vm298_vm0, %v294_v58, %v295_v52  ;;  %v291_v14 = vadd.f32 %v611_v4, %v285_v61  ;;  %v324_v61 = vsel %vm321_vm3, %v317_v46, %v318_v10 }
  0xd3   :  { %v182_v56 = vpop.f32.mrf.mxu1  ;;  %v310_v15 = vmul.f32 %v937_v62, %v301_v1 }
  0xd4   :  { %v199_v59 = vmul.f32 0.16666667, %v195_v53  ;;  %v183_v60 = vadd.f32 %v609_v20, %v182_v56  ;;  %v235_v20 = vand.u32 15, %v209_v63 }
  0xd5   :  { %v314_v31 = vadd.f32 %v310_v15, %v291_v14 }
  0xd6   :  { %v203_v2 = vmul.f32 %v199_v59, %v180_v40  ;;  %v188_v3 = vadd.f32 3.0, %v183_v60  ;;  %vm273_vm5 = vcmp.ne.s32.totalorder %v235_v20, 15  ;;  %v378_v40 = vld [vmem:[#allocation7 + $0x10] sm:$0xff] }
  0xd7   :  { %v597_v41 = vsel %vm273_vm5, 1.0, %v828_v5  ;;  %412 = vmatpush.msrb.mxu1 %v378_v40  ;;  %v434_v5 = vld [vmem:[#allocation8 + $0x70] sm:$0xff] }
  0xd8   :  { %v296_v11 = vrot.slane %v203_v2, 7  ;;  %v319_v12 = vrot.slane %v203_v2, 1  ;;  %v192_v13 = vmax.f32 %v188_v3, 0.0  ;;  %v286_v26 = vmul.f32 %v610_v54, %v203_v2  ;;  %v435_v3 = vld [vmem:[#allocation8 + $0x78] sm:$0xff] }
  0xd9   :  { %413 = vmatpush.msrb.mxu1 %v377_v49  ;;  %438 = vmatpush.msra.mxu2 %v435_v3  ;;  %v486_v3 = vld [vmem:[#allocation10 + $0x70] sm:$0xff] }
  0xda   :  { %v300_v22 = vsel %vm298_vm0, %v295_v52, %v296_v11  ;;  %v323_v23 = vsel %vm321_vm3, %v318_v10, %v319_v12  ;;  %v196_v24 = vmin.f32 %v192_v13, 6.0  ;;  %v292_v37 = vadd.f32 %v611_v4, %v286_v26 }
  0xdb   :  { %v305_v27 = vmul.f32 %v595_v6, %v300_v22  ;;  %v327_v28 = vmul.f32 %v596_v7, %v323_v23  ;;  %v332_v6 = vmul.f32 %v613_v25, %v324_v61  ;;  %439 = vmatpush.msra.mxu2 %v434_v5  ;;  %v422_v61 = vld [vmem:[#allocation8 + $0x10] sm:$0xff]  ;;  %v485_v5 = vld [vmem:[#allocation10 + $0x68] sm:$0xff] }
  0xdc   :  { %v200_v30 = vmul.f32 0.16666667, %v196_v24 }
  0xdd   :  { %v311_v33 = vmul.f32 %v937_v62, %v305_v27  ;;  %v333_v34 = vmul.f32 %v613_v25, %v327_v28 }
  0xde   :  { %v204_v36 = vmul.f32 %v200_v30, %v183_v60  ;;  %v376_v60 = vld [vmem:[#allocation7] sm:$0xff] }
  0xdf   :  { %v955_v38 = vadd.f32 %v333_v34, %v314_v31  ;;  %v315_v48 = vadd.f32 %v311_v33, %v292_v37  ;;  %414 = vmatpush.msrb.mxu1 %v376_v60  ;;  %v428_v34 = vld [vmem:[#allocation8 + $0x40] sm:$0xff] }
  0xe0   :  { %v287_v42 = vmul.f32 %v610_v54, %v204_v36  ;;  %v297_v43 = vrot.slane %v204_v36, 7  ;;  %v320_v44 = vrot.slane %v204_v36, 1 }
  0xe1   :  { %v341_v50 = vadd.f32 3.0, %v955_v38 }
  0xe2   :  { %v293_v51 = vadd.f32 %v611_v4, %v287_v42  ;;  %v299_v52 = vsel %vm298_vm0, %v296_v11, %v297_v43  ;;  %v302_v53 = vsel %vm298_vm0, %v297_v43, %v294_v58  ;;  %v322_v55 = vsel %vm321_vm3, %v319_v12, %v320_v44  ;;  %v433_v12 = vld [vmem:[#allocation8 + $0x68] sm:$0xff]  ;;  %v432_v4 = vld [vmem:[#allocation8 + $0x60] sm:$0xff]  ;;  %v426_v42 = vld [vmem:[#allocation8 + $0x30] sm:$0xff] }
  0xe3   :  { %v303_v54 = vmul.f32 %v594_v39, %v302_v53  ;;  %v312_v56 = vmul.f32 %v937_v62, %v299_v52  ;;  %v325_v57 = vsel %vm321_vm3, %v320_v44, %v317_v46  ;;  %v334_v59 = vmul.f32 %v613_v25, %v322_v55  ;;  %440 = vmatpush.msra.mxu2 %v433_v12  ;;  %v427_v39 = vld [vmem:[#allocation8 + $0x38] sm:$0xff]  ;;  %v482_v12 = vld [vmem:[#allocation10 + $0x50] sm:$0xff] }
  0xe4   :  { %v329_v63 = vmul.f32 %v597_v41, %v325_v57  ;;  %v345_v9 = vmax.f32 %v341_v50, 0.0 }
  0xe5   :  { %v309_v58 = vmul.f32 %v937_v62, %v303_v54  ;;  %v316_v0 = vadd.f32 %v312_v56, %v293_v51  ;;  %v338_v1 = vadd.f32 %v334_v59, %v315_v48  ;;  %441 = vmatpush.msra.mxu2 %v432_v4  ;;  %v423_v51 = vld [vmem:[#allocation8 + $0x18] sm:$0xff]  ;;  %v480_v4 = vld [vmem:[#allocation10 + $0x40] sm:$0xff] }
  0xe6   :  { %v335_v2 = vmul.f32 %v613_v25, %v329_v63  ;;  %v349_v62 = vmin.f32 %v345_v9, 6.0  ;;  %v430_v25 = vld [vmem:[#allocation8 + $0x50] sm:$0xff]  ;;  %v421_v63 = vld [vmem:[#allocation8 + $0x8] sm:$0xff]  ;;  %v483_v9 = vld [vmem:[#allocation10 + $0x58] sm:$0xff] }
  0xe7   :  { %v313_v7 = vadd.f32 %v309_v58, %v290_v47  ;;  %v342_v8 = vadd.f32 3.0, %v338_v1  ;;  %442 = vmatpush.msra.mxu2 %v431_v21  ;;  %v420_v47 = vld [vmem:[#allocation8] sm:$0xff]  ;;  %v503_v58 = vld [vmem:[#allocation11 + $0x78] sm:$0xff] }
  0xe8   :  { %v339_v11 = vadd.f32 %v335_v2, %v316_v0  ;;  %v353_v27 = vmul.f32 0.16666667, %v349_v62  ;;  %v502_v0 = vld [vmem:[#allocation11 + $0x70] sm:$0xff]  ;;  %504 = vmatpush.msra.mxu3 %v503_v58  ;;  %v501_v2 = vld [vmem:[#allocation11 + $0x68] sm:$0xff] }
  0xe9   :  { %v346_v32 = vmax.f32 %v342_v8, 0.0  ;;  %v336_v10 = vadd.f32 %v332_v6, %v313_v7  ;;  %443 = vmatpush.msra.mxu2 %v430_v25  ;;  %v500_v6 = vld [vmem:[#allocation11 + $0x60] sm:$0xff]  ;;  %v499_v8 = vld [vmem:[#allocation11 + $0x58] sm:$0xff]  ;;  %v494_v62 = vld [vmem:[#allocation11 + $0x30] sm:$0xff] }
  0xea   :  { %v343_v13 = vadd.f32 3.0, %v339_v11  ;;  %v981_v36 = vmul.f32 %v353_v27, %v955_v38  ;;  %v424_v38 = vld [vmem:[#allocation8 + $0x20] sm:$0xff]  ;;  %505 = vmatpush.msra.mxu3 %v502_v0  ;;  %v479_v25 = vld [vmem:[#allocation10 + $0x38] sm:$0xff]  ;;  %v478_v27 = vld [vmem:[#allocation10 + $0x30] sm:$0xff] }
  0xeb   :  { %v340_v14 = vadd.f32 3.0, %v336_v10  ;;  %v350_v15 = vmin.f32 %v346_v32, 6.0  ;;  %444 = vmatpush.msra.mxu2 %v429_v29  ;;  %v484_v7 = vld [vmem:[#allocation10 + $0x60] sm:$0xff]  ;;  %v497_v32 = vld [vmem:[#allocation11 + $0x48] sm:$0xff] }
  0xec   :  { %v347_v20 = vmax.f32 %v343_v13, 0.0  ;;  %506 = vmatpush.msra.mxu3 %v501_v2  ;;  %v496_v13 = vld [vmem:[#allocation11 + $0x40] sm:$0xff]  ;;  %v477_v29 = vld [vmem:[#allocation10 + $0x28] sm:$0xff] }
  0xed   :  { %v344_v22 = vmax.f32 %v340_v14, 0.0  ;;  %v354_v24 = vmul.f32 0.16666667, %v350_v15  ;;  %445 = vmatpush.msra.mxu2 %v428_v34  ;;  %v495_v14 = vld [vmem:[#allocation11 + $0x38] sm:$0xff]  ;;  %v493_v15 = vld [vmem:[#allocation11 + $0x28] sm:$0xff]  ;;  %v476_v34 = vld [vmem:[#allocation10 + $0x20] sm:$0xff] }
  0xee   :  { %v351_v23 = vmin.f32 %v347_v20, 6.0  ;;  %507 = vmatpush.msra.mxu3 %v500_v6  ;;  %v614_v20 = vld [vmem:[#allocation13 + $0x2] ss:$0 sm:$0xff] }
  0xef   :  { %v348_v26 = vmin.f32 %v344_v22, 6.0  ;;  %v974_v31 = vmul.f32 %v354_v24, %v338_v1  ;;  %446 = vmatpush.msra.mxu2 %v427_v39  ;;  %v487_v1 = vld [vmem:[#allocation10 + $0x78] sm:$0xff]  ;;  %v492_v24 = vld [vmem:[#allocation11 + $0x20] sm:$0xff] }
  0xf0   :  { %v355_v28 = vmul.f32 0.16666667, %v351_v23  ;;  %533 = vmatpush.msra.mxu0 %v487_v1  ;;  %508 = vmatpush.msra.mxu3 %v499_v8  ;;  %v475_v39 = vld [vmem:[#allocation10 + $0x18] sm:$0xff] }
  0xf1   :  { %v352_v30 = vmul.f32 0.16666667, %v348_v26  ;;  %447 = vmatpush.msra.mxu2 %v426_v42  ;;  %v491_v26 = vld [vmem:[#allocation11 + $0x18] sm:$0xff]  ;;  %v472_v42 = vld [vmem:[#allocation10] sm:$0xff] }
  0xf2   :  { %v976_v33 = vmul.f32 %v355_v28, %v339_v11  ;;  %534 = vmatpush.msra.mxu0 %v486_v3  ;;  %v498_v11 = vld [vmem:[#allocation11 + $0x50] sm:$0xff] }
  0xf3   :  { %v978_v35 = vmul.f32 %v352_v30, %v336_v10  ;;  %448 = vmatpush.msra.mxu2 %v425_v45  ;;  %509 = vmatpush.msra.mxu3 %v498_v11  ;;  %v481_v10 = vld [vmem:[#allocation10 + $0x48] sm:$0xff]  ;;  %v490_v28 = vld [vmem:[#allocation11 + $0x10] sm:$0xff] }
  0xf4   :  { %v367_v37 = vadd.f32 %v976_v33, %v974_v31  ;;  %535 = vmatpush.msra.mxu0 %v485_v5  ;;  %v489_v30 = vld [vmem:[#allocation11 + $0x8] sm:$0xff] }
  0xf5   :  { %v360_v40 = vadd.f32 %v981_v36, %v978_v35  ;;  %449 = vmatpush.msra.mxu2 %v424_v38  ;;  %510 = vmatpush.msra.mxu3 %v497_v32 }
  0xf6   :  { %v368_v41 = vrot.slane %v367_v37, 4  ;;  %536 = vmatpush.msra.mxu0 %v484_v7 }
  0xf7   :  { %v361_v43 = vrot.slane %v360_v40, 4  ;;  %450 = vmatpush.msra.mxu2 %v423_v51  ;;  %511 = vmatpush.msra.mxu3 %v496_v13 }
  0xf8   :  { %v369_v44 = vadd.f32 %v368_v41, %v367_v37  ;;  %537 = vmatpush.msra.mxu0 %v483_v9  ;;  %v488_v37 = vld [vmem:[#allocation11] sm:$0xff]  ;;  %v473_v41 = vld [vmem:[#allocation10 + $0x8] sm:$0xff] }
  0xf9   :  { %v362_v46 = vadd.f32 %v361_v43, %v360_v40  ;;  %451 = vmatpush.msra.mxu2 %v422_v61  ;;  %512 = vmatpush.msra.mxu3 %v495_v14  ;;  %v474_v40 = vld [vmem:[#allocation10 + $0x10] sm:$0xff]  ;;  %v615_v43 = vld [vmem:[#allocation13 + $0x3] ss:$0 sm:$0xff] }
  0xfa   :  { %v370_v48 = vrot.slane %v369_v44, 2  ;;  %538 = vmatpush.msra.mxu0 %v482_v12 }
  0xfb   :  { %v363_v49 = vrot.slane %v362_v46, 2  ;;  %452 = vmatpush.msra.mxu2 %v421_v63  ;;  %513 = vmatpush.msra.mxu3 %v494_v62 }
  0xfc   :  { %v371_v50 = vadd.f32 %v370_v48, %v369_v44  ;;  %539 = vmatpush.msra.mxu0 %v481_v10 }
  0xfd   :  { %v364_v52 = vadd.f32 %v363_v49, %v362_v46  ;;  %453 = vmatpush.msra.mxu2 %v420_v47  ;;  %514 = vmatpush.msra.mxu3 %v493_v15 }
  0xfe   :  { %v372_v53 = vrot.slane %v371_v50, 1  ;;  %540 = vmatpush.msra.mxu0 %v480_v4 }
  0xff   :  { %v365_v55 = vrot.slane %v364_v52, 1  ;;  %515 = vmatpush.msra.mxu3 %v492_v24 }
 0x100   :  { %v373_v54 = vadd.f32 %v372_v53, %v371_v50  ;;  %541 = vmatpush.msra.mxu0 %v479_v25 }
 0x101   :  { %v366_v56 = vadd.f32 %v365_v55, %v364_v52  ;;  %516 = vmatpush.msra.mxu3 %v491_v26  ;;  %v616_v55 = vld [vmem:[#allocation13 + $0x4] ss:$0 sm:$0xff] }
 0x102   :  { %v375_v59 = vmul.f32 0.0625, %v373_v54  ;;  %542 = vmatpush.msra.mxu0 %v478_v27 }
 0x103   :  { %v374_v57 = vmul.f32 0.0625, %v366_v56  ;;  %517 = vmatpush.msra.mxu3 %v490_v28 }
 0x104   :  { %543 = vmatpush.msra.mxu0 %v477_v29 }
 0x105   :  { %v397_v60 = vsel %vm396_vm6, %v375_v59, %v374_v57  ;;  %518 = vmatpush.msra.mxu3 %v489_v30 }
 0x106   :  { %415 = vmatmul.f32.vlgmr.msrb.gmra.mxu1 %v397_v60  ;;  %544 = vmatpush.msra.mxu0 %v476_v34 }
 0x107   :  { %519 = vmatpush.msra.mxu3 %v488_v37 }
 0x108   :  { %545 = vmatpush.msra.mxu0 %v475_v39  ;;  %520 = vmatmul.f32.vlgmr.msra.gmra.mxu3 %v909_v16 }
 0x10a   :  { %546 = vmatpush.msra.mxu0 %v474_v40 }
 0x10c   :  { %547 = vmatpush.msra.mxu0 %v473_v41 }
 0x10e   :  { %548 = vmatpush.msra.mxu0 %v472_v42 }
 0x110   :  { %523 = vmatmul.f32.gmra.mxu3 %v912_v17 }
 0x118   :  { %526 = vmatmul.f32.gmra.mxu3 %v915_v18 }
 0x120   :  { %529 = vmatmul.f32.gmra.mxu3 %v918_v19 }
 0x183   :  { %v416_v21 = vpop.f32.mrf.mxu1 }
 0x184   :  { %v417_v22 = vadd.f32 %v614_v20, %v416_v21 }
 0x186   :  { %v419_v23 = vmax.f32 %v417_v22, 0.0 }
 0x188   :  { %454 = vmatmul.f32.vlgmr.msra.gmra.mxu2 %v419_v23 }
 0x18b   :  { %v521_v19 = vpop.f32.mrf.mxu3 }
 0x193   :  { %v524_v57 = vpop.f32.mrf.mxu3 }
 0x20b   :  { %v455_v44 = vpop.f32.mrf.mxu2 }
 0x20c   :  { %v456_v45 = vadd.f32 %v615_v43, %v455_v44 }
 0x20e   :  { %v458_v46 = vadd.f32 3.0, %v456_v45 }
 0x210   :  { %v459_v48 = vmax.f32 %v458_v46, 0.0 }
 0x212   :  { %v460_v38 = vmin.f32 %v459_v48, 6.0 }
 0x214   :  { %v461_v49 = vmul.f32 0.16666667, %v460_v38 }
 0x216   :  { %v464_v50 = vperm.slane %v461_v49, 0  ;;  %v463_v52 = vrot.slane %v461_v49, 1 }
 0x218   :  { %v468_v16 = vmul.f32 %v464_v50, %v978_v35  ;;  %v469_v51 = vmul.f32 %v464_v50, %v981_v36  ;;  %v465_v17 = vperm.slane %v463_v52, 0  ;;  %v527_v36 = vpop.f32.mrf.mxu3 }
 0x21a   :  { %549 = vmatmul.f32.vlgmr.msra.gmra.mxu0 %v468_v16  ;;  %v470_v18 = vmul.f32 %v465_v17, %v974_v31  ;;  %v471_v53 = vmul.f32 %v465_v17, %v976_v33 }
 0x220   :  { %v530_v31 = vpop.f32.mrf.mxu3 }
 0x222   :  { %552 = vmatmul.f32.gmra.mxu0 %v469_v51 }
 0x22a   :  { %555 = vmatmul.f32.gmra.mxu0 %v470_v18 }
 0x232   :  { %558 = vmatmul.f32.gmra.mxu0 %v471_v53 }
 0x297   :  { %v550_v54 = vpop.f32.mrf.mxu0 }
 0x298   :  { %v551_v56 = vadd.f32 %v550_v54, %v521_v19 }
 0x29a   :  { %v564_v59 = vadd.f32 %v616_v55, %v551_v56 }
 0x29c   :  { %568 = vst [vmem:[#allocation14] sm:$0xff] %v564_v59 }
 0x29f   :  { %v553_v35 = vpop.f32.mrf.mxu0 }
 0x2a0   :  { %v554_v60 = vadd.f32 %v553_v35, %v524_v57 }
 0x2a2   :  { %v565_v61 = vadd.f32 %v616_v55, %v554_v60 }
 0x2a4   :  { %569 = vst [vmem:[#allocation14 + $0x8] sm:$0xff] %v565_v61 }
 0x2a7   :  { %v556_v63 = vpop.f32.mrf.mxu0 }
 0x2a8   :  { %v557_v47 = vadd.f32 %v556_v63, %v527_v36 }
 0x2aa   :  { %v566_v58 = vadd.f32 %v616_v55, %v557_v47 }
 0x2ac   :  { %570 = vst [vmem:[#allocation14 + $0x10] sm:$0xff] %v566_v58 }
 0x2af   :  { %v559_v0 = vpop.f32.mrf.mxu0 }
 0x2b0   :  { %v560_v33 = vadd.f32 %v559_v0, %v530_v31 }
 0x2b2   :  { %v567_v1 = vadd.f32 %v616_v55, %v560_v33 }
 0x2b4   :  { %571 = vst [vmem:[#allocation14 + $0x18] sm:$0xff] %v567_v1 }
 0x2b5   :  { %584 = dma.vmem_to_hbm [thread:$0]  %s577_s11, 512, %s579_s14, [#allocation4], %s820_s9, %s820_s9, %s821_s10  }
 0x2b6   :  { %817 = dma.done.wait [#allocation4], 512  }
 0x2b7   :  { %818 = vsyncadd [#allocation4], 4294966784 }
 0x2b8   :  { %589 = vsyncpa [#allocation3], 1 }
 0x2b9   :  { %590 = vsyncpa [#allocation6], 1 }
 0x2ba   :  { %591 = vsyncpa [#allocation9], 1 }
 0x2bb   :  { %592 = vsyncpa [#allocation12], 1 }
 0x2bc   :  { %593 = vsyncpa [#allocation4], 1 }

</bundles_post_ra>
